<compile_context>
chip_gen: v7x
topology: tpu7x:2x2x1
jax: 0.10.0
libtpu: 0.0.40
codegen_flags: <defaults>
</compile_context>

<pallas_src>
import jax
import jax.numpy as jnp
from jax.experimental import pallas as pl
from jax.experimental.pallas import tpu as pltpu

LANE = 128      # vreg lane width
SUBLANE = 8     # vreg sublane count


# --------------------------------------------------------------------------
# Kernel
# --------------------------------------------------------------------------
def gcn_classifier_kernel(a_ref, x_ref, w1_ref, b1_ref, pa_ref, w2_ref,
                          gb2_ref, wfc_ref, bfc_ref, out_ref):
    mm = w1_ref.dtype                                   # matmul (MXU) dtype

    # ---- GCN layer 1: (A_hat @ X) @ W1 + b1, then ReLU -------------------
    ax = jnp.dot(a_ref[...], x_ref[...],
                 preferred_element_type=jnp.float32)               # [N, Fin]
    h = jnp.dot(ax.astype(mm), w1_ref[...],
                preferred_element_type=jnp.float32) + b1_ref[...]  # [N, H]
    h = jnp.maximum(h, 0.0)
    # dropout(p=0.5, training=False) -> identity (inference mode)

    # ---- GCN layer 2 fused with global_add_pool --------------------------
    #   P @ (A @ (h W2) + 1 b2)  ==  (P A) @ (h W2) + counts[:,None] * b2
    hw2 = jnp.dot(h.astype(mm), w2_ref[...],
                  preferred_element_type=jnp.float32)               # [N, H]
    g = jnp.dot(pa_ref[...], hw2.astype(mm),
                preferred_element_type=jnp.float32) + gb2_ref[...]  # [G, H]

    # ---- fc + log_softmax (padded class columns carry a -1e30 bias) ------
    logits = jnp.dot(g.astype(mm), wfc_ref[...],
                     preferred_element_type=jnp.float32) + bfc_ref[...]  # [G, Cp]
    m = jnp.max(logits, axis=1, keepdims=True)
    z = logits - m
    lse = jnp.log(jnp.sum(jnp.exp(z), axis=1, keepdims=True))
    out_ref[...] = z - lse


# --------------------------------------------------------------------------
# Wrapper-side shaping / folding (plain JAX glue)
# --------------------------------------------------------------------------
def _round_up(n, m):
    return ((n + m - 1) // m) * m


def _pad2(a, rows, cols):
    return jnp.pad(a, ((0, rows - a.shape[0]), (0, cols - a.shape[1])))


def _prepare_operands(x, a_hat, pool, params, mm_dtype):
    n, fin = x.shape
    g = pool.shape[0]
    hid = params["w1"].shape[1]
    c = params["wfc"].shape[1]

    n_p = _round_up(n, LANE)        # N is the lane dim of a_hat / PA
    g_p = _round_up(g, SUBLANE)
    fin_p = _round_up(fin, LANE)
    hid_p = _round_up(hid, LANE)
    c_p = _round_up(c, LANE)        # lane-dense output

    a_p = _pad2(a_hat, n_p, n_p).astype(mm_dtype)
    x_p = _pad2(x, n_p, fin_p).astype(mm_dtype)
    w1_p = _pad2(params["w1"], fin_p, hid_p).astype(mm_dtype)
    b1_p = _pad2(params["b1"], 1, hid_p).astype(jnp.float32)
    w2_p = _pad2(params["w2"], hid_p, hid_p).astype(mm_dtype)
    wfc_p = _pad2(params["wfc"], hid_p, c_p).astype(mm_dtype)

    # Fold global_add_pool into layer 2: PA = pool @ a_hat (built once, f32),
    # and b2 scaled by per-graph node counts to keep the result exact.
    pa_p = _pad2(pool @ a_hat, g_p, n_p).astype(mm_dtype)
    counts = jnp.pad(jnp.sum(pool, axis=1), (0, g_p - g))
    gb2_p = (counts[:, None] *
             _pad2(params["b2"], 1, hid_p)).astype(jnp.float32)     # [Gp, Hp]

    # -1e30 bias on padded class columns -> exp() contributes 0, so the
    # log_softmax over the real classes is unchanged; slicing happens outside.
    bfc_p = jnp.full((1, c_p), -1e30, jnp.float32)
    bfc_p = bfc_p.at[0, :c].set(params["bfc"].astype(jnp.float32)[0, :c])

    ops = (a_p, x_p, w1_p, b1_p, pa_p, w2_p, gb2_p, wfc_p, bfc_p)
    return ops, (g, c), (n_p, g_p, fin_p, hid_p, c_p)


def _cost_estimate(n_p, g_p, fin_p, hid_p, c_p, ops):
    flops = 2 * (n_p * n_p * fin_p        # A @ X
                 + n_p * fin_p * hid_p    # (AX) @ W1
                 + n_p * hid_p * hid_p    # h @ W2
                 + g_p * n_p * hid_p      # PA @ (hW2)
                 + g_p * hid_p * c_p)     # g @ Wfc
    bytes_accessed = sum(int(o.size) * o.dtype.itemsize for o in ops)
    bytes_accessed += g_p * c_p * 4       # output
    return pl.CostEstimate(flops=flops, transcendentals=g_p * c_p,
                           bytes_accessed=bytes_accessed)


def gcn_graph_classifier(x, a_hat, pool, params, mm_dtype=jnp.bfloat16):
    """Full GCN-classifier forward in a single Pallas kernel call."""
    ops, (n_graphs, n_classes), dims = _prepare_operands(
        x, a_hat, pool, params, mm_dtype)
    g_p, c_p = dims[1], dims[4]

    vmem = pl.BlockSpec(memory_space=pltpu.MemorySpace.VMEM)
    out_padded = pl.pallas_call(
        gcn_classifier_kernel,
        out_shape=jax.ShapeDtypeStruct((g_p, c_p), jnp.float32),
        in_specs=[vmem] * len(ops),
        out_specs=vmem,
        cost_estimate=_cost_estimate(*dims, ops),
    )(*ops)
    # Slice padded graphs / classes off outside the kernel (keeps the kernel's
    # store lane-dense and unmasked).
    return out_padded[:n_graphs, :n_classes]


# --------------------------------------------------------------------------
# Graph glue (plain JAX): dense normalized adjacency + pooling matrix
# --------------------------------------------------------------------------
def build_normalized_adjacency(edge_index, num_nodes):
    """Dense D^{-1/2}(A + I)D^{-1/2} from edge_index [2, E].

    Uses .add so duplicate edges accumulate into A and the degree, matching
    PyG's GCNConv normalization."""
    src, dst = edge_index[0], edge_index[1]
    a = jnp.zeros((num_nodes, num_nodes), jnp.float32)
    # message flows src -> dst: out[dst] += x[src]  =>  A[dst, src] += 1
    a = a.at[dst, src].add(1.0)
    a = a + jnp.eye(num_nodes, dtype=jnp.float32)          # self-loops
    deg = jnp.sum(a, axis=1)
    d_inv_sqrt = jnp.where(deg > 0, 1.0 / jnp.sqrt(deg), 0.0)
    return d_inv_sqrt[:, None] * a * d_inv_sqrt[None, :]


def build_pool_matrix(batch, num_graphs, num_nodes):
    """P[g, n] = 1 if node n belongs to graph g (global_add_pool as matmul)."""
    return (batch[None, :] == jnp.arange(num_graphs)[:, None]).astype(jnp.float32)


def init_params(key, in_channels, hidden_channels, out_channels):
    k1, k2, k3 = jax.random.split(key, 3)

    def glorot(k, fan_in, fan_out):
        lim = jnp.sqrt(6.0 / (fan_in + fan_out))
        return jax.random.uniform(k, (fan_in, fan_out), jnp.float32, -lim, lim)

    return {
        "w1": glorot(k1, in_channels, hidden_channels),
        "b1": jnp.zeros((1, hidden_channels), jnp.float32),
        "w2": glorot(k2, hidden_channels, hidden_channels),
        "b2": jnp.zeros((1, hidden_channels), jnp.float32),
        "wfc": glorot(k3, hidden_channels, out_channels),
        "bfc": jnp.zeros((1, out_channels), jnp.float32),
    }


# --------------------------------------------------------------------------
# References for self-checks
# --------------------------------------------------------------------------
def reference_forward_f32(x, a_hat, pool, params):
    """Un-folded, un-padded f32 forward (mirrors the PyTorch module math)."""
    h = jnp.maximum(a_hat @ (x @ params["w1"]) + params["b1"], 0.0)
    h = a_hat @ (h @ params["w2"]) + params["b2"]
    g = pool @ h
    return jax.nn.log_softmax(g @ params["wfc"] + params["bfc"], axis=1)


def reference_forward_padded(ops, n_graphs, n_classes):
    """Same folded / bf16-cast algebra as the kernel, in plain JAX."""
    a, x, w1, b1, pa, w2, gb2, wfc, bfc = ops
    mm = w1.dtype
    ax = jnp.dot(a, x, preferred_element_type=jnp.float32)
    h = jnp.maximum(jnp.dot(ax.astype(mm), w1,
                            preferred_element_type=jnp.float32) + b1, 0.0)
    hw2 = jnp.dot(h.astype(mm), w2, preferred_element_type=jnp.float32)
    g = jnp.dot(pa, hw2.astype(mm), preferred_element_type=jnp.float32) + gb2
    logits = jnp.dot(g.astype(mm), wfc,
                     preferred_element_type=jnp.float32) + bfc
    return jax.nn.log_softmax(logits, axis=1)[:n_graphs, :n_classes]


# --------------------------------------------------------------------------
if __name__ == "__main__":
    key = jax.random.PRNGKey(0)

    in_channels = 16
    hidden_channels = 32
    out_channels = 8
    nodes_per_graph = 8
    num_graphs = 4
    num_nodes = num_graphs * nodes_per_graph      # 32

    kx, kp = jax.random.split(key)
    x = jax.random.normal(kx, (num_nodes, in_channels), jnp.float32)

    # batch vector: node -> graph id.
    batch = jnp.repeat(jnp.arange(num_graphs), nodes_per_graph)

    # Undirected ring inside each graph (edge_index as [2, E]).
    src_list, dst_list = [], []
    for gi in range(num_graphs):
        base = gi * nodes_per_graph
        for i in range(nodes_per_graph):
            u = base + i
            v = base + (i + 1) % nodes_per_graph
            src_list += [u, v]
            dst_list += [v, u]
    edge_index = jnp.array([src_list, dst_list], dtype=jnp.int32)

    a_hat = build_normalized_adjacency(edge_index, num_nodes)
    pool = build_pool_matrix(batch, num_graphs, num_nodes)
    params = init_params(kp, in_channels, hidden_channels, out_channels)

    out = jax.block_until_ready(gcn_graph_classifier(x, a_hat, pool, params))

    assert out.shape == (num_graphs, out_channels)
    # log_softmax rows should sum (in prob space) to ~1.
    assert jnp.allclose(jnp.sum(jnp.exp(out), axis=1), 1.0, atol=1e-4)

    # Kernel fidelity: identical folded/bf16 math in plain JAX.
    ops, (g_real, c_real), _ = _prepare_operands(x, a_hat, pool, params,
                                                 jnp.bfloat16)
    ref_same_math = reference_forward_padded(ops, g_real, c_real)
    assert jnp.allclose(out, ref_same_math, atol=2e-3, rtol=2e-3)

    # Semantics vs the plain f32, un-folded module math (loose tol due to the
    # bf16 MXU operand cast).
    ref_f32 = reference_forward_f32(x, a_hat, pool, params)
    assert jnp.allclose(out, ref_f32, atol=0.25)

    print("KERNEL_OK")
</pallas_src>

<mosaic_0001>
module attributes {stable_mosaic.version = 11 : i64} {
  func.func @gcn_classifier_kernel(%arg0: memref<128x128xbf16, #tpu.memory_space<vmem>>, %arg1: memref<128x128xbf16, #tpu.memory_space<vmem>>, %arg2: memref<128x128xbf16, #tpu.memory_space<vmem>>, %arg3: memref<1x128xf32, #tpu.memory_space<vmem>>, %arg4: memref<8x128xbf16, #tpu.memory_space<vmem>>, %arg5: memref<128x128xbf16, #tpu.memory_space<vmem>>, %arg6: memref<8x128xf32, #tpu.memory_space<vmem>>, %arg7: memref<128x128xbf16, #tpu.memory_space<vmem>>, %arg8: memref<1x128xf32, #tpu.memory_space<vmem>>, %arg9: memref<8x128xf32, #tpu.memory_space<vmem>>) attributes {dimension_semantics = [], scalar_prefetch = 0 : i64, scratch_operands = 0 : i64, tpu.core_type = #tpu.core_type<tc>} {
    %c0 = arith.constant 0 : index
    %c0_0 = arith.constant 0 : index
    %0 = vector.load %arg0[%c0, %c0_0] : memref<128x128xbf16, #tpu.memory_space<vmem>>, vector<128x128xbf16>
    %c0_1 = arith.constant 0 : index
    %c0_2 = arith.constant 0 : index
    %1 = vector.load %arg1[%c0_1, %c0_2] : memref<128x128xbf16, #tpu.memory_space<vmem>>, vector<128x128xbf16>
    %cst = arith.constant dense<0.000000e+00> : vector<128x128xf32>
    %2 = tpu.matmul %0, %1, %cst {dimension_numbers = #tpu.dot_dimension_numbers<[1], [0], [0], [1], [0, 0, 1, 1], [], []>} : vector<128x128xbf16>, vector<128x128xbf16>, vector<128x128xf32> -> vector<128x128xf32>
    %3 = arith.truncf %2 : vector<128x128xf32> to vector<128x128xbf16>
    %c0_3 = arith.constant 0 : index
    %c0_4 = arith.constant 0 : index
    %4 = vector.load %arg2[%c0_3, %c0_4] : memref<128x128xbf16, #tpu.memory_space<vmem>>, vector<128x128xbf16>
    %cst_5 = arith.constant dense<0.000000e+00> : vector<128x128xf32>
    %5 = tpu.matmul %3, %4, %cst_5 {dimension_numbers = #tpu.dot_dimension_numbers<[1], [0], [0], [1], [0, 0, 1, 1], [], []>} : vector<128x128xbf16>, vector<128x128xbf16>, vector<128x128xf32> -> vector<128x128xf32>
    %c0_6 = arith.constant 0 : index
    %c0_7 = arith.constant 0 : index
    %6 = vector.load %arg3[%c0_6, %c0_7] : memref<1x128xf32, #tpu.memory_space<vmem>>, vector<1x128xf32>
    %7 = vector.broadcast %6 : vector<1x128xf32> to vector<128x128xf32>
    %8 = arith.addf %5, %7 : vector<128x128xf32>
    %cst_8 = arith.constant 0.000000e+00 : f32
    %9 = vector.broadcast %cst_8 : f32 to vector<128x128xf32>
    %10 = arith.maximumf %8, %9 : vector<128x128xf32>
    %11 = arith.truncf %10 : vector<128x128xf32> to vector<128x128xbf16>
    %c0_9 = arith.constant 0 : index
    %c0_10 = arith.constant 0 : index
    %12 = vector.load %arg5[%c0_9, %c0_10] : memref<128x128xbf16, #tpu.memory_space<vmem>>, vector<128x128xbf16>
    %cst_11 = arith.constant dense<0.000000e+00> : vector<128x128xf32>
    %13 = tpu.matmul %11, %12, %cst_11 {dimension_numbers = #tpu.dot_dimension_numbers<[1], [0], [0], [1], [0, 0, 1, 1], [], []>} : vector<128x128xbf16>, vector<128x128xbf16>, vector<128x128xf32> -> vector<128x128xf32>
    %c0_12 = arith.constant 0 : index
    %c0_13 = arith.constant 0 : index
    %14 = vector.load %arg4[%c0_12, %c0_13] : memref<8x128xbf16, #tpu.memory_space<vmem>>, vector<8x128xbf16>
    %15 = arith.truncf %13 : vector<128x128xf32> to vector<128x128xbf16>
    %cst_14 = arith.constant dense<0.000000e+00> : vector<8x128xf32>
    %16 = tpu.matmul %14, %15, %cst_14 {dimension_numbers = #tpu.dot_dimension_numbers<[1], [0], [0], [1], [0, 0, 1, 1], [], []>} : vector<8x128xbf16>, vector<128x128xbf16>, vector<8x128xf32> -> vector<8x128xf32>
    %c0_15 = arith.constant 0 : index
    %c0_16 = arith.constant 0 : index
    %17 = vector.load %arg6[%c0_15, %c0_16] : memref<8x128xf32, #tpu.memory_space<vmem>>, vector<8x128xf32>
    %18 = arith.addf %16, %17 : vector<8x128xf32>
    %19 = arith.truncf %18 : vector<8x128xf32> to vector<8x128xbf16>
    %c0_17 = arith.constant 0 : index
    %c0_18 = arith.constant 0 : index
    %20 = vector.load %arg7[%c0_17, %c0_18] : memref<128x128xbf16, #tpu.memory_space<vmem>>, vector<128x128xbf16>
    %cst_19 = arith.constant dense<0.000000e+00> : vector<8x128xf32>
    %21 = tpu.matmul %19, %20, %cst_19 {dimension_numbers = #tpu.dot_dimension_numbers<[1], [0], [0], [1], [0, 0, 1, 1], [], []>} : vector<8x128xbf16>, vector<128x128xbf16>, vector<8x128xf32> -> vector<8x128xf32>
    %c0_20 = arith.constant 0 : index
    %c0_21 = arith.constant 0 : index
    %22 = vector.load %arg8[%c0_20, %c0_21] : memref<1x128xf32, #tpu.memory_space<vmem>>, vector<1x128xf32>
    %23 = vector.broadcast %22 : vector<1x128xf32> to vector<8x128xf32>
    %24 = arith.addf %21, %23 : vector<8x128xf32>
    %cst_22 = arith.constant dense<0xFF800000> : vector<8xf32>
    %25 = vector.multi_reduction <maximumf>, %24, %cst_22 [1] : vector<8x128xf32> to vector<8xf32>
    %26 = vector.shape_cast %25 : vector<8xf32> to vector<8x1xf32>
    %27 = vector.broadcast %26 : vector<8x1xf32> to vector<8x128xf32>
    %28 = arith.subf %24, %27 : vector<8x128xf32>
    %29 = math.exp %28 : vector<8x128xf32>
    %cst_23 = arith.constant dense<0.000000e+00> : vector<8xf32>
    %30 = vector.multi_reduction <add>, %29, %cst_23 [1] : vector<8x128xf32> to vector<8xf32>
    %31 = vector.shape_cast %30 : vector<8xf32> to vector<8x1xf32>
    %32 = math.log %31 : vector<8x1xf32>
    %33 = vector.broadcast %32 : vector<8x1xf32> to vector<8x128xf32>
    %34 = arith.subf %28, %33 : vector<8x128xf32>
    %c0_24 = arith.constant 0 : index
    %c0_25 = arith.constant 0 : index
    %35 = vector.load %arg9[%c0_24, %c0_25] : memref<8x128xf32, #tpu.memory_space<vmem>>, vector<8x128xf32>
    tpu.vector_store %arg9[%c0_24, %c0_25], %34 {strides = array<i32>} : memref<8x128xf32, #tpu.memory_space<vmem>>, vector<8x128xf32>,
    return
  }
}

</mosaic_0001>

<bundles_post_ra>
// kernel: tpu_custom_call.1
= control target key start
LH: loop header
LB: loop body
LE: loop exit
PB: predicated region body
PF: predicated region fallthrough
CT: control target
= control target key end

     0   :  { %14 = vsyncpa [#allocation3], 0  ;;  %s1507_s0 = inlined_call_operand.hbm [shape: bf16[128,128], index: 0, kind: input, shape index: {}]   ;;  %s1508_s1 = inlined_call_operand.hbm [shape: bf16[128,128], index: 1, kind: input, shape index: {}]   ;;  %s1509_s2 = inlined_call_operand.hbm [shape: bf16[128,128], index: 2, kind: input, shape index: {}]   ;;  %s1510_s3 = inlined_call_operand.vmem [shape: f32[1,128], index: 3, kind: input, shape index: {}]   ;;  %s1511_s4 = inlined_call_operand.vmem [shape: bf16[8,128], index: 4, kind: input, shape index: {}]   ;;  %s1512_s5 = inlined_call_operand.hbm [shape: bf16[128,128], index: 5, kind: input, shape index: {}]   ;;  %s1513_s6 = inlined_call_operand.vmem [shape: f32[8,128], index: 6, kind: input, shape index: {}]   ;;  %s1514_s7 = inlined_call_operand.hbm [shape: bf16[128,128], index: 7, kind: input, shape index: {}]   ;;  %s1515_s8 = inlined_call_operand.vmem [shape: f32[1,128], index: 8, kind: input, shape index: {}]   ;;  %s1516_s9 = inlined_call_operand.hbm [shape: f32[8,128], index: 9, kind: output, shape index: {}]  }
   0x1   :  { %15 = vsyncpa [#allocation6], 0 }
   0x2   :  { %16 = vsyncpa [#allocation9], 0 }
   0x3   :  { %17 = vsyncpa [#allocation4], 0  ;;  %s1316_s30 = smov [#allocation5]   ;;  %s1317_s11 = smov [#allocation8]  }
   0x4   :  { %s35_s10 = sshll.u32 %s1316_s30, 4  ;;  %s63_s12 = sshll.u32 %s1317_s11, 4  ;;  %s36_s10 = int_to_ptr.vmem [resolvable:$true] %s35_s10  ;;  %s1376_s12 = int_to_ptr.vmem [resolvable:$true] %s63_s12 }
   0x5   :  { %s1176_s15 = scalar_lea.hbm %s1508_s1, 1024 }
   0x6   :  { %p1177_p0 = scmp.ne.s32.totalorder %s1508_s1, %s1176_s15  ;;  %p1180_p1 = scmp.lt.u32.totalorder %s1176_s15, %s1508_s1 }
   0x8   :  { %p1182_p2 = pnand %p1180_p1, %p1177_p0 }
   0xa   :  { %1185 = shalt.err (!%p1182_p2)
}
   0xb   :  { %s1186_s20 = scalar_lea.vmem %s36_s10, 1024  ;;  %p1191_p4 = scmp.lt.s32.totalorder %s36_s10, %s36_s10 }
   0xc   :  { %p1187_p3 = scmp.ne.s32.totalorder %s36_s10, %s1186_s20  ;;  %p1192_p5 = scmp.lt.s32.totalorder %s1186_s20, %s1186_s20 }
   0xe   :  { %p1193_p6 = por %p1192_p5, %p1191_p4 }
  0x10   :  { %p1194_p7 = pnand %p1193_p6, %p1187_p3 }
  0x12   :  { %1197 = shalt.err (!%p1194_p7)
}
  0x13   :  { %s1318_s21 = smov 64   ;;  %s1319_s22 = smov 4  }
  0x14   :  { %41 = dma.hbm_to_vmem [thread:$0]  %s1508_s1, 1024, %s36_s10, [#allocation6], %s1318_s21, %s1318_s21, %s1319_s22  }
  0x15   :  { %s1198_s27 = scalar_lea.hbm %s1512_s5, 1024 }
  0x16   :  { %p1199_p8 = scmp.ne.s32.totalorder %s1512_s5, %s1198_s27  ;;  %p1202_p9 = scmp.lt.u32.totalorder %s1198_s27, %s1512_s5 }
  0x18   :  { %p1204_p10 = pnand %p1202_p9, %p1199_p8 }
  0x1a   :  { %1207 = shalt.err (!%p1204_p10)
}
  0x1b   :  { %s1208_s13 = scalar_lea.vmem %s1376_s12, 1024  ;;  %p1213_p12 = scmp.lt.s32.totalorder %s1376_s12, %s1376_s12 }
  0x1c   :  { %p1209_p11 = scmp.ne.s32.totalorder %s1376_s12, %s1208_s13  ;;  %p1214_p13 = scmp.lt.s32.totalorder %s1208_s13, %s1208_s13 }
  0x1e   :  { %p1215_p0 = por %p1214_p13, %p1213_p12 }
  0x20   :  { %p1216_p1 = pnand %p1215_p0, %p1209_p11 }
  0x22   :  { %1219 = shalt.err (!%p1216_p1)
}
  0x23   :  { %69 = dma.hbm_to_vmem [thread:$0]  %s1512_s5, 1024, %s1376_s12, [#allocation9], %s1318_s21, %s1318_s21, %s1319_s22  }
  0x24   :  { %s1320_s14 = smov [#allocation2]   ;;  %s1321_s16 = smov [#allocation7]  }
  0x25   :  { %s23_s15 = sshll.u32 %s1320_s14, 4  ;;  %s47_s17 = sshll.u32 %s1321_s16, 4  ;;  %s24_s15 = int_to_ptr.vmem [resolvable:$true] %s23_s15  ;;  %s1413_s17 = int_to_ptr.vmem [resolvable:$true] %s47_s17 }
  0x26   :  { %s1220_s20 = scalar_lea.hbm %s1507_s0, 1024 }
  0x27   :  { %p1221_p2 = scmp.ne.s32.totalorder %s1507_s0, %s1220_s20  ;;  %p1224_p3 = scmp.lt.u32.totalorder %s1220_s20, %s1507_s0 }
  0x29   :  { %p1226_p4 = pnand %p1224_p3, %p1221_p2 }
  0x2b   :  { %1229 = shalt.err (!%p1226_p4)
}
  0x2c   :  { %s1230_s5 = scalar_lea.vmem %s24_s15, 1024  ;;  %p1235_p6 = scmp.lt.s32.totalorder %s24_s15, %s24_s15 }
  0x2d   :  { %p1231_p5 = scmp.ne.s32.totalorder %s24_s15, %s1230_s5  ;;  %p1236_p7 = scmp.lt.s32.totalorder %s1230_s5, %s1230_s5 }
  0x2f   :  { %p1237_p8 = por %p1236_p7, %p1235_p6 }
  0x31   :  { %p1238_p9 = pnand %p1237_p8, %p1231_p5 }
  0x33   :  { %1241 = shalt.err (!%p1238_p9)
}
  0x34   :  { %29 = dma.hbm_to_vmem [thread:$0]  %s1507_s0, 1024, %s24_s15, [#allocation3], %s1318_s21, %s1318_s21, %s1319_s22  }
  0x35   :  { %s1242_s30 = scalar_lea.hbm %s1509_s2, 1024 }
  0x36   :  { %p1243_p10 = scmp.ne.s32.totalorder %s1509_s2, %s1242_s30  ;;  %p1246_p11 = scmp.lt.u32.totalorder %s1242_s30, %s1509_s2 }
  0x38   :  { %p1248_p12 = pnand %p1246_p11, %p1243_p10 }
  0x3a   :  { %1251 = shalt.err (!%p1248_p12)
}
  0x3b   :  { %s1252_s14 = scalar_lea.vmem %s1413_s17, 1024  ;;  %p1257_p0 = scmp.lt.s32.totalorder %s1413_s17, %s1413_s17 }
  0x3c   :  { %p1253_p13 = scmp.ne.s32.totalorder %s1413_s17, %s1252_s14  ;;  %p1258_p1 = scmp.lt.s32.totalorder %s1252_s14, %s1252_s14 }
  0x3e   :  { %p1259_p2 = por %p1258_p1, %p1257_p0 }
  0x40   :  { %p1260_p3 = pnand %p1259_p2, %p1253_p13 }
  0x42   :  { %1263 = shalt.err (!%p1260_p3)
}
  0x43   :  { %53 = dma.hbm_to_vmem [thread:$0]  %s1509_s2, 1024, %s1413_s17, [#allocation6], %s1318_s21, %s1318_s21, %s1319_s22  }
  0x44   :  { %s1322_s16 = smov [#allocation10]   ;;  %s1264_s23 = scalar_lea.hbm %s1514_s7, 1024 }
  0x45   :  { %s77_s18 = sshll.u32 %s1322_s16, 4  ;;  %p1265_p4 = scmp.ne.s32.totalorder %s1514_s7, %s1264_s23  ;;  %s78_s18 = int_to_ptr.vmem [resolvable:$true] %s77_s18 }
  0x46   :  { %p1268_p5 = scmp.lt.u32.totalorder %s1264_s23, %s1514_s7 }
  0x48   :  { %p1270_p6 = pnand %p1268_p5, %p1265_p4 }
  0x4a   :  { %1273 = shalt.err (!%p1270_p6)
}
  0x4b   :  { %s1274_s12 = scalar_lea.vmem %s78_s18, 1024  ;;  %p1279_p8 = scmp.lt.s32.totalorder %s78_s18, %s78_s18 }
  0x4c   :  { %p1275_p7 = scmp.ne.s32.totalorder %s78_s18, %s1274_s12  ;;  %p1280_p9 = scmp.lt.s32.totalorder %s1274_s12, %s1274_s12 }
  0x4e   :  { %p1281_p10 = por %p1280_p9, %p1279_p8 }
  0x50   :  { %p1282_p11 = pnand %p1281_p10, %p1275_p7 }
  0x52   :  { %1285 = shalt.err (!%p1282_p11)
}
  0x53   :  { %83 = dma.hbm_to_vmem [thread:$0]  %s1514_s7, 1024, %s78_s18, [#allocation9], %s1318_s21, %s1318_s21, %s1319_s22  }
  0x54   :  { %1308 = dma.done.wait [#allocation3], 1024  }
  0x55   :  { %1309 = vsyncadd [#allocation3], 4294966272 }
  0x56   :  { %1310 = dma.done.wait [#allocation6], 2048  }
  0x57   :  { %1311 = vsyncadd [#allocation6], 4294965248 }
  0x58   :  { %1312 = dma.done.wait [#allocation9], 2048  }
  0x59   :  { %1313 = vsyncadd [#allocation9], 4294965248  ;;  %v1132_v0 = vld [vmem:[#allocation5] sm:$0xff]   ;;  %v1133_v1 = vld [vmem:[#allocation5 + $0x8] sm:$0xff]   ;;  %vm1324_vm0 = vmmov 0  }
  0x5a   :  { %986 = vmatprep.subr.bf16.mxu0 %v1132_v0  ;;  %v1134_v2 = vld [vmem:[#allocation5 + $0x10] sm:$0xff]   ;;  %v1135_v3 = vld [vmem:[#allocation5 + $0x18] sm:$0xff]   ;;  %v1140_v4 = vld [vmem:[#allocation2] sm:$0xff]  }
  0x5b   :  { %987 = vmatpush3.bf16.msra.mxu0 %v1132_v0  ;;  %1002 = vmatprep.mubr.bf16.mxu0 %v1140_v4  ;;  %v1136_v5 = vld [vmem:[#allocation5 + $0x20] sm:$0xff]   ;;  %v1137_v6 = vld [vmem:[#allocation5 + $0x28] sm:$0xff]   ;;  %v1138_v9 = vld [vmem:[#allocation5 + $0x30] sm:$0xff]  }
  0x5c   :  { %988 = vmatprep.subr.bf16.mxu0 %v1133_v1  ;;  %v1148_v7 = vld [vmem:[#allocation7] sm:$0xff]   ;;  %v1149_v8 = vld [vmem:[#allocation7 + $0x8] sm:$0xff]   ;;  %v1150_v10 = vld [vmem:[#allocation7 + $0x10] sm:$0xff]  }
  0x5d   :  { %1018 = vmatprep.subr.bf16.mxu1 %v1148_v7  ;;  %v1139_v11 = vld [vmem:[#allocation5 + $0x38] sm:$0xff]   ;;  %v1152_v13 = vld [vmem:[#allocation7 + $0x20] sm:$0xff]   ;;  %v1141_v14 = vld [vmem:[#allocation2 + $0x8] sm:$0xff]  }
  0x5e   :  { %1019 = vmatpush3.bf16.msra.mxu1 %v1148_v7  ;;  %v1151_v12 = vld [vmem:[#allocation7 + $0x18] sm:$0xff]   ;;  %v1142_v15 = vld [vmem:[#allocation2 + $0x10] sm:$0xff]   ;;  %v1153_v16 = vld [vmem:[#allocation7 + $0x28] sm:$0xff]  }
  0x5f   :  { %989 = vmatpush3.bf16.msra.mxu0 %v1133_v1  ;;  %1020 = vmatprep.subr.bf16.mxu1 %v1149_v8  ;;  %v1154_v17 = vld [vmem:[#allocation7 + $0x30] sm:$0xff]   ;;  %v1143_v18 = vld [vmem:[#allocation2 + $0x18] sm:$0xff]   ;;  %v1144_v19 = vld [vmem:[#allocation2 + $0x20] sm:$0xff]  }
  0x60   :  { %990 = vmatprep.subr.bf16.mxu0 %v1134_v2  ;;  %v1145_v20 = vld [vmem:[#allocation2 + $0x28] sm:$0xff]   ;;  %v1146_v21 = vld [vmem:[#allocation2 + $0x30] sm:$0xff]   ;;  %v1147_v22 = vld [vmem:[#allocation2 + $0x38] sm:$0xff]  }
  0x61   :  { %v1155_v23 = vld [vmem:[#allocation7 + $0x38] sm:$0xff]   ;;  %v1156_v24 = vld [vmem:[#allocation8] sm:$0xff]   ;;  %v1157_v25 = vld [vmem:[#allocation8 + $0x8] sm:$0xff]  }
  0x62   :  { %1021 = vmatpush3.bf16.msra.mxu1 %v1149_v8  ;;  %v1158_v26 = vld [vmem:[#allocation8 + $0x10] sm:$0xff]   ;;  %v1159_v27 = vld [vmem:[#allocation8 + $0x18] sm:$0xff]   ;;  %v1160_v28 = vld [vmem:[#allocation8 + $0x20] sm:$0xff]  }
  0x63   :  { %991 = vmatpush3.bf16.msra.mxu0 %v1134_v2  ;;  %1022 = vmatprep.subr.bf16.mxu1 %v1150_v10  ;;  %v1161_v29 = vld [vmem:[#allocation8 + $0x28] sm:$0xff]   ;;  %v1162_v54 = vld [vmem:[#allocation8 + $0x30] sm:$0xff]   ;;  %v1163_v55 = vld [vmem:[#allocation8 + $0x38] sm:$0xff]  }
  0x64   :  { %992 = vmatprep.subr.bf16.mxu0 %v1135_v3  ;;  %v894_v56 = vld [vmem:[%s1510_s3] ss:$0 sm:$0xff] }
  0x66   :  { %1023 = vmatpush3.bf16.msra.mxu1 %v1150_v10 }
  0x67   :  { %993 = vmatpush3.bf16.msra.mxu0 %v1135_v3  ;;  %1024 = vmatprep.subr.bf16.mxu1 %v1151_v12 }
  0x68   :  { %994 = vmatprep.subr.bf16.mxu0 %v1136_v5 }
  0x6a   :  { %1025 = vmatpush3.bf16.msra.mxu1 %v1151_v12 }
  0x6b   :  { %995 = vmatpush3.bf16.msra.mxu0 %v1136_v5  ;;  %1026 = vmatprep.subr.bf16.mxu1 %v1152_v13 }
  0x6c   :  { %996 = vmatprep.subr.bf16.mxu0 %v1137_v6 }
  0x6e   :  { %1027 = vmatpush3.bf16.msra.mxu1 %v1152_v13 }
  0x6f   :  { %997 = vmatpush3.bf16.msra.mxu0 %v1137_v6  ;;  %1028 = vmatprep.subr.bf16.mxu1 %v1153_v16 }
  0x70   :  { %998 = vmatprep.subr.bf16.mxu0 %v1138_v9 }
  0x72   :  { %1029 = vmatpush3.bf16.msra.mxu1 %v1153_v16 }
  0x73   :  { %999 = vmatpush3.bf16.msra.mxu0 %v1138_v9  ;;  %1030 = vmatprep.subr.bf16.mxu1 %v1154_v17 }
  0x74   :  { %1000 = vmatprep.subr.bf16.mxu0 %v1139_v11 }
  0x76   :  { %1031 = vmatpush3.bf16.msra.mxu1 %v1154_v17 }
  0x77   :  { %1001 = vmatpush3.bf16.msra.mxu0 %v1139_v11  ;;  %1032 = vmatprep.subr.bf16.mxu1 %v1155_v23 }
  0x78   :  { %1050 = vmatprep.subr.bf16.mxu0 %v1156_v24 }
  0x7a   :  { %1003 = vmatmul.mubr.bf16.vlgmr.msra.gmra.mrb[0].mxu0 %v1141_v14  ;;  %1033 = vmatpush3.bf16.msra.mxu1 %v1155_v23 }
  0x7b   :  { %1006 = vmatprep.mubr.bf16.mxu0 %v1142_v15  ;;  %1051 = vmatpush3.bf16.msra.mxu0 %v1156_v24 }
  0x7c   :  { %1052 = vmatprep.subr.bf16.mxu0 %v1157_v25 }
  0x7f   :  { %1053 = vmatpush3.bf16.msra.mxu0 %v1157_v25 }
  0x80   :  { %1054 = vmatprep.subr.bf16.mxu0 %v1158_v26 }
  0x82   :  { %1007 = vmatmul.mubr.bf16.gmra.mrb[4].mxu0 %v1143_v18 }
  0x83   :  { %1010 = vmatprep.mubr.bf16.mxu0 %v1144_v19  ;;  %1055 = vmatpush3.bf16.msra.mxu0 %v1158_v26 }
  0x84   :  { %1056 = vmatprep.subr.bf16.mxu0 %v1159_v27 }
  0x87   :  { %1057 = vmatpush3.bf16.msra.mxu0 %v1159_v27 }
  0x88   :  { %1058 = vmatprep.subr.bf16.mxu0 %v1160_v28 }
  0x8a   :  { %1011 = vmatmul.mubr.bf16.gmra.mrb[8].mxu0 %v1145_v20 }
  0x8b   :  { %1014 = vmatprep.mubr.bf16.mxu0 %v1146_v21  ;;  %1059 = vmatpush3.bf16.msra.mxu0 %v1160_v28 }
  0x8c   :  { %1060 = vmatprep.subr.bf16.mxu0 %v1161_v29 }
  0x8f   :  { %1061 = vmatpush3.bf16.msra.mxu0 %v1161_v29 }
  0x90   :  { %1062 = vmatprep.subr.bf16.mxu0 %v1162_v54 }
  0x92   :  { %1015 = vmatmul.mubr.bf16.gmra.mrb[12].mxu0 %v1147_v22 }
  0x93   :  { %1063 = vmatpush3.bf16.msra.mxu0 %v1162_v54  ;;  %v1168_v54 = vld [vmem:[#allocation10 + $0x20] sm:$0xff]  }
  0x94   :  { %1064 = vmatprep.subr.bf16.mxu0 %v1163_v55 }
  0x97   :  { %1065 = vmatpush3.bf16.msra.mxu0 %v1163_v55  ;;  %v1169_v55 = vld [vmem:[#allocation10 + $0x28] sm:$0xff]  }
 0x14d   :  { %v1004_v30 = vpop.f32.mrb[0].mxu0 }
 0x14e   :  { %v264_v31 = vpop.f32.mrb[1].mxu0 }
 0x14f   :  { %v1005_v32 = vpop.f32.mrb[2].mxu0 }
 0x150   :  { %v328_v33 = vpack.c.bf16 %v1005_v32, %v1004_v30  ;;  %v267_v34 = vpop.f32.mrb[3].mxu0 }
 0x151   :  { %v327_v35 = vpack.c.bf16 %v267_v34, %v264_v31 }
 0x153   :  { %1034 = vmatprep.mubr.bf16.mxu1 %v327_v35 }
 0x154   :  { %1035 = vmatmul.mubr.bf16.vlgmr.msra.gmra.mrb[0].mxu1 %v328_v33 }
 0x155   :  { %v1008_v36 = vpop.f32.mrb[4].mxu0 }
 0x156   :  { %v280_v37 = vpop.f32.mrb[5].mxu0 }
 0x157   :  { %v1009_v38 = vpop.f32.mrb[6].mxu0 }
 0x158   :  { %v330_v39 = vpack.c.bf16 %v1009_v38, %v1008_v36  ;;  %v283_v40 = vpop.f32.mrb[7].mxu0 }
 0x159   :  { %v329_v41 = vpack.c.bf16 %v283_v40, %v280_v37 }
 0x15b   :  { %1038 = vmatprep.mubr.bf16.mxu1 %v329_v41 }
 0x15c   :  { %1039 = vmatmul.mubr.bf16.gmra.mrb[4].mxu1 %v330_v39 }
 0x15d   :  { %v1012_v42 = vpop.f32.mrb[8].mxu0 }
 0x15e   :  { %v296_v43 = vpop.f32.mrb[9].mxu0 }
 0x15f   :  { %v1013_v44 = vpop.f32.mrb[10].mxu0 }
 0x160   :  { %v332_v45 = vpack.c.bf16 %v1013_v44, %v1012_v42  ;;  %v299_v46 = vpop.f32.mrb[11].mxu0 }
 0x161   :  { %v331_v47 = vpack.c.bf16 %v299_v46, %v296_v43 }
 0x163   :  { %1042 = vmatprep.mubr.bf16.mxu1 %v331_v47 }
 0x164   :  { %1043 = vmatmul.mubr.bf16.gmra.mrb[8].mxu1 %v332_v45 }
 0x165   :  { %v1016_v48 = vpop.f32.mrb[12].mxu0 }
 0x166   :  { %v312_v49 = vpop.f32.mrb[13].mxu0 }
 0x167   :  { %v1017_v50 = vpop.f32.mrb[14].mxu0 }
 0x168   :  { %v334_v51 = vpack.c.bf16 %v1017_v50, %v1016_v48  ;;  %v315_v52 = vpop.f32.mrb[15].mxu0  ;;  %v1164_v50 = vld [vmem:[#allocation10] sm:$0xff]  }
 0x169   :  { %v333_v53 = vpack.c.bf16 %v315_v52, %v312_v49  ;;  %v1323_v49 = vmov 0.0   ;;  %v1166_v52 = vld [vmem:[#allocation10 + $0x10] sm:$0xff]  }
 0x16a   :  { %1082 = vmatprep.subr.bf16.mxu1 %v1323_v49  ;;  %1102 = vmatprep.subr.bf16.mxu0 %v1323_v49 }
 0x16b   :  { %1046 = vmatprep.mubr.bf16.mxu1 %v333_v53  ;;  %v1167_v53 = vld [vmem:[#allocation10 + $0x18] sm:$0xff]  }
 0x16c   :  { %1047 = vmatmul.mubr.bf16.gmra.mrb[12].mxu1 %v334_v51  ;;  %v1165_v51 = vld [vmem:[#allocation10 + $0x8] sm:$0xff]  }
 0x16d   :  { %1098 = vmatprep.mubr.msk.bf16.mxu1 %vm1324_vm0, %v1323_v49 }
 0x227   :  { %v1036_v57 = vpop.f32.mrb[0].mxu1 }
 0x228   :  { %v449_v58 = vadd.f32 %v1036_v57, %v894_v56  ;;  %v440_v59 = vpop.f32.mrb[1].mxu1 }
 0x229   :  { %v441_v60 = vadd.f32 %v894_v56, %v440_v59  ;;  %v1037_v61 = vpop.f32.mrb[2].mxu1 }
 0x22a   :  { %v452_v62 = vadd.f32 %v1037_v61, %v894_v56  ;;  %v443_v63 = vpop.f32.mrb[3].mxu1  ;;  %v505_v1 = vmax.f32 %v449_v58, 0.0 }
 0x22b   :  { %v444_v0 = vadd.f32 %v894_v56, %v443_v63  ;;  %v503_v3 = vmax.f32 %v441_v60, 0.0 }
 0x22c   :  { %v506_v2 = vmax.f32 %v452_v62, 0.0 }
 0x22d   :  { %v504_v4 = vmax.f32 %v444_v0, 0.0 }
 0x22e   :  { %v520_v5 = vpack.c.bf16 %v506_v2, %v505_v1 }
 0x22f   :  { %v519_v6 = vpack.c.bf16 %v504_v4, %v503_v3  ;;  %v1040_v7 = vpop.f32.mrb[4].mxu1 }
 0x230   :  { %v465_v8 = vadd.f32 %v1040_v7, %v894_v56  ;;  %v456_v9 = vpop.f32.mrb[5].mxu1 }
 0x231   :  { %v457_v10 = vadd.f32 %v894_v56, %v456_v9  ;;  %v1041_v11 = vpop.f32.mrb[6].mxu1  ;;  %1066 = vmatprep.mubr.bf16.mxu0 %v519_v6 }
 0x232   :  { %v468_v12 = vadd.f32 %v1041_v11, %v894_v56  ;;  %v459_v13 = vpop.f32.mrb[7].mxu1  ;;  %1067 = vmatmul.mubr.bf16.vlgmr.msra.gmra.mrb[16].mxu0 %v520_v5  ;;  %v509_v15 = vmax.f32 %v465_v8, 0.0 }
 0x233   :  { %v460_v14 = vadd.f32 %v894_v56, %v459_v13  ;;  %v507_v17 = vmax.f32 %v457_v10, 0.0  ;;  %1103 = vmatpush3.bf16.msra.mxu0 %v1164_v50 }
 0x234   :  { %v510_v16 = vmax.f32 %v468_v12, 0.0  ;;  %1104 = vmatprep.subr.bf16.mxu0 %v1323_v49 }
 0x235   :  { %v508_v18 = vmax.f32 %v460_v14, 0.0 }
 0x236   :  { %v522_v19 = vpack.c.bf16 %v510_v16, %v509_v15 }
 0x237   :  { %v521_v20 = vpack.c.bf16 %v508_v18, %v507_v17  ;;  %v1044_v21 = vpop.f32.mrb[8].mxu1  ;;  %1105 = vmatpush3.bf16.msra.mxu0 %v1165_v51  ;;  %v688_v17 = vld [vmem:[%s1511_s4] sm:$0xf]  ;;  %v1171_v18 = vld [vmem:[#allocation10 + $0x38] sm:$0xff]   ;;  %s1325_s4 = smov [#allocation11]  }
 0x238   :  { %v481_v22 = vadd.f32 %v1044_v21, %v894_v56  ;;  %v472_v23 = vpop.f32.mrb[9].mxu1  ;;  %1106 = vmatprep.subr.bf16.mxu0 %v1323_v49 }
 0x239   :  { %v473_v24 = vadd.f32 %v894_v56, %v472_v23  ;;  %v1045_v25 = vpop.f32.mrb[10].mxu1  ;;  %1070 = vmatprep.mubr.bf16.mxu0 %v521_v20 }
 0x23a   :  { %v484_v26 = vadd.f32 %v1045_v25, %v894_v56  ;;  %v475_v27 = vpop.f32.mrb[11].mxu1  ;;  %1071 = vmatmul.mubr.bf16.gmra.mrb[20].mxu0 %v522_v19  ;;  %v513_v29 = vmax.f32 %v481_v22, 0.0  ;;  %v697_v19 = vld [vmem:[%s1513_s6] sm:$0xff]  ;;  %s867_s6 = sshll.u32 %s1325_s4, 4  ;;  %s868_s6 = int_to_ptr.vmem [resolvable:$true] %s867_s6 }
 0x23b   :  { %v476_v28 = vadd.f32 %v894_v56, %v475_v27  ;;  %v511_v31 = vmax.f32 %v473_v24, 0.0  ;;  %1107 = vmatpush3.bf16.msra.mxu0 %v1166_v52  ;;  %p1291_p13 = scmp.lt.s32.totalorder %s868_s6, %s868_s6 }
 0x23c   :  { %v514_v30 = vmax.f32 %v484_v26, 0.0  ;;  %1108 = vmatprep.subr.bf16.mxu0 %v1323_v49  ;;  %v911_v26 = vld [vmem:[%s1515_s8] ss:$0 sm:$0xff]  ;;  %s1286_s8 = scalar_lea.vmem %s868_s6, 128 }
 0x23d   :  { %v512_v32 = vmax.f32 %v476_v28, 0.0  ;;  %p1287_p12 = scmp.ne.s32.totalorder %s868_s6, %s1286_s8  ;;  %p1292_p0 = scmp.lt.s32.totalorder %s1286_s8, %s1286_s8 }
 0x23e   :  { %v524_v33 = vpack.c.bf16 %v514_v30, %v513_v29 }
 0x23f   :  { %v523_v34 = vpack.c.bf16 %v512_v32, %v511_v31  ;;  %v1048_v35 = vpop.f32.mrb[12].mxu1  ;;  %1109 = vmatpush3.bf16.msra.mxu0 %v1167_v53  ;;  %p1293_p1 = por %p1292_p0, %p1291_p13 }
 0x240   :  { %v497_v36 = vadd.f32 %v1048_v35, %v894_v56  ;;  %v488_v37 = vpop.f32.mrb[13].mxu1  ;;  %1110 = vmatprep.subr.bf16.mxu0 %v1323_v49 }
 0x241   :  { %v489_v38 = vadd.f32 %v894_v56, %v488_v37  ;;  %v1049_v39 = vpop.f32.mrb[14].mxu1  ;;  %1074 = vmatprep.mubr.bf16.mxu0 %v523_v34  ;;  %p1294_p2 = pnand %p1293_p1, %p1287_p12 }
 0x242   :  { %v500_v40 = vadd.f32 %v1049_v39, %v894_v56  ;;  %v491_v41 = vpop.f32.mrb[15].mxu1  ;;  %1075 = vmatmul.mubr.bf16.gmra.mrb[24].mxu0 %v524_v33  ;;  %v517_v43 = vmax.f32 %v497_v36, 0.0 }
 0x243   :  { %v492_v42 = vadd.f32 %v894_v56, %v491_v41  ;;  %v515_v45 = vmax.f32 %v489_v38, 0.0  ;;  %1111 = vmatpush3.bf16.msra.mxu0 %v1168_v54  ;;  %v1170_v56 = vld [vmem:[#allocation10 + $0x30] sm:$0xff]  }
 0x244   :  { %v518_v44 = vmax.f32 %v500_v40, 0.0  ;;  %1112 = vmatprep.subr.bf16.mxu0 %v1323_v49 }
 0x245   :  { %v516_v46 = vmax.f32 %v492_v42, 0.0 }
 0x246   :  { %v526_v47 = vpack.c.bf16 %v518_v44, %v517_v43 }
 0x247   :  { %v525_v48 = vpack.c.bf16 %v516_v46, %v515_v45  ;;  %1113 = vmatpush3.bf16.msra.mxu0 %v1169_v55 }
 0x248   :  { %1114 = vmatprep.subr.bf16.mxu0 %v1323_v49 }
 0x249   :  { %1078 = vmatprep.mubr.bf16.mxu0 %v525_v48 }
 0x24a   :  { %1079 = vmatmul.mubr.bf16.gmra.mrb[28].mxu0 %v526_v47 }
 0x24b   :  { %1118 = vmatprep.mubr.msk.bf16.mxu0 %vm1324_vm0, %v1323_v49  ;;  %1115 = vmatpush3.bf16.msra.mxu0 %v1170_v56 }
 0x24c   :  { %1116 = vmatprep.subr.bf16.mxu0 %v1323_v49 }
 0x24f   :  { %1117 = vmatpush3.bf16.msra.mxu0 %v1171_v18 }
 0x305   :  { %v1068_v57 = vpop.f32.mrb[16].mxu0 }
 0x306   :  { %v625_v58 = vpop.f32.mrb[17].mxu0 }
 0x307   :  { %v1069_v59 = vpop.f32.mrb[18].mxu0 }
 0x308   :  { %v690_v60 = vpack.c.bf16 %v1069_v59, %v1068_v57  ;;  %v628_v61 = vpop.f32.mrb[19].mxu0 }
 0x309   :  { %v689_v62 = vpack.c.bf16 %v628_v61, %v625_v58 }
 0x30b   :  { %1083 = vmatpush3.bf16.msra.mxu1 %v689_v62 }
 0x30c   :  { %1084 = vmatprep.subr.bf16.mxu1 %v1323_v49 }
 0x30d   :  { %v1072_v63 = vpop.f32.mrb[20].mxu0 }
 0x30e   :  { %v641_v0 = vpop.f32.mrb[21].mxu0 }
 0x30f   :  { %v1073_v1 = vpop.f32.mrb[22].mxu0  ;;  %1085 = vmatpush3.bf16.msra.mxu1 %v690_v60 }
 0x310   :  { %v692_v2 = vpack.c.bf16 %v1073_v1, %v1072_v63  ;;  %v644_v3 = vpop.f32.mrb[23].mxu0  ;;  %1086 = vmatprep.subr.bf16.mxu1 %v1323_v49 }
 0x311   :  { %v691_v4 = vpack.c.bf16 %v644_v3, %v641_v0 }
 0x313   :  { %1087 = vmatpush3.bf16.msra.mxu1 %v691_v4 }
 0x314   :  { %1088 = vmatprep.subr.bf16.mxu1 %v1323_v49 }
 0x315   :  { %v1076_v5 = vpop.f32.mrb[24].mxu0 }
 0x316   :  { %v657_v6 = vpop.f32.mrb[25].mxu0 }
 0x317   :  { %v1077_v7 = vpop.f32.mrb[26].mxu0  ;;  %1089 = vmatpush3.bf16.msra.mxu1 %v692_v2 }
 0x318   :  { %v694_v8 = vpack.c.bf16 %v1077_v7, %v1076_v5  ;;  %v660_v9 = vpop.f32.mrb[27].mxu0  ;;  %1090 = vmatprep.subr.bf16.mxu1 %v1323_v49 }
 0x319   :  { %v693_v10 = vpack.c.bf16 %v660_v9, %v657_v6 }
 0x31b   :  { %1091 = vmatpush3.bf16.msra.mxu1 %v693_v10 }
 0x31c   :  { %1092 = vmatprep.subr.bf16.mxu1 %v1323_v49 }
 0x31d   :  { %v1080_v11 = vpop.f32.mrb[28].mxu0 }
 0x31e   :  { %v673_v12 = vpop.f32.mrb[29].mxu0 }
 0x31f   :  { %v1081_v13 = vpop.f32.mrb[30].mxu0  ;;  %1093 = vmatpush3.bf16.msra.mxu1 %v694_v8 }
 0x320   :  { %v696_v14 = vpack.c.bf16 %v1081_v13, %v1080_v11  ;;  %v676_v15 = vpop.f32.mrb[31].mxu0  ;;  %1094 = vmatprep.subr.bf16.mxu1 %v1323_v49 }
 0x321   :  { %v695_v16 = vpack.c.bf16 %v676_v15, %v673_v12 }
 0x323   :  { %1095 = vmatpush3.bf16.msra.mxu1 %v695_v16 }
 0x324   :  { %1096 = vmatprep.subr.bf16.mxu1 %v1323_v49 }
 0x327   :  { %1097 = vmatpush3.bf16.msra.mxu1 %v696_v14 }
 0x32a   :  { %1099 = vmatmul.mubr.bf16.vlgmr.msra.gmra.mrb[16].mxu1 %v688_v17 }
 0x3fd   :  { %v732_v20 = vpop.f32.mrb[16].mxu1 }
 0x3fe   :  { %v733_v21 = vadd.f32 %v732_v20, %v697_v19  ;;  %v1100_v22 = vpop.f32.mrb[17].mxu1 }
 0x3ff   :  { %v735_v23 = vpop.f32.mrb[18].mxu1 }
 0x400   :  { %v738_v24 = vpack.c.bf16 %v733_v21, %v733_v21  ;;  %v1101_v25 = vpop.f32.mrb[19].mxu1 }
 0x402   :  { %1119 = vmatmul.mubr.bf16.vlgmr.msra.gmra.mrb[32].mxu0 %v738_v24 }
 0x4d5   :  { %v844_v27 = vpop.f32.mrb[32].mxu0 }
 0x4d6   :  { %v845_v28 = vadd.f32 %v911_v26, %v844_v27  ;;  %v1120_v29 = vpop.f32.mrb[33].mxu0 }
 0x4d7   :  { %v847_v30 = vpop.f32.mrb[34].mxu0 }
 0x4d8   :  { %850 = vmax.xlane.f32.xlu0 %v845_v28  ;;  %v1121_v31 = vpop.f32.mrb[35].mxu0 }
 0x565   :  { %v851_v32 = vpop.xlane.xlu0 %850 }
 0x566   :  { %v852_v33 = vsub.f32 %v845_v28, %v851_v32 }
 0x568   :  { %v853_v34 = vmul.f32 1.442695, %v852_v33 }
 0x56a   :  { %1172 = vpow2.f32 %v853_v34 }
 0x574   :  { %v1173_v35 = vpop.eup %1172 }
 0x575   :  { %855 = vadd.xlane.f32.xlu0 %v1173_v35 }
 0x602   :  { %v856_v36 = vpop.xlane.xlu0 %855 }
 0x603   :  { %1174 = vlog2.f32 %v856_v36 }
 0x60d   :  { %v1175_v37 = vpop.eup %1174 }
 0x60e   :  { %v858_v38 = vmul.f32 0.6931472, %v1175_v37 }
 0x610   :  { %v859_v39 = vsub.f32 %v852_v33, %v858_v38 }
 0x612   :  { %860 = vst [vmem:[#allocation11] sm:$0xff] %v859_v39 }
 0x613   :  { %1297 = shalt.err (!%p1294_p2)
}
 0x614   :  { %s1298_s1 = scalar_lea.hbm %s1516_s9, 128 }
 0x615   :  { %p1299_p3 = scmp.ne.s32.totalorder %s1516_s9, %s1298_s1  ;;  %p1302_p4 = scmp.lt.u32.totalorder %s1298_s1, %s1516_s9 }
 0x617   :  { %p1304_p5 = pnand %p1302_p4, %p1299_p3 }
 0x619   :  { %1307 = shalt.err (!%p1304_p5)
}
 0x61a   :  { %870 = dma.vmem_to_hbm [thread:$0]  %s868_s6, 128, %s1516_s9, [#allocation4]  }
 0x61b   :  { %1314 = dma.done.wait [#allocation4], 128  }
 0x61c   :  { %1315 = vsyncadd [#allocation4], 4294967168 }
 0x61d   :  { %874 = vsyncpa [#allocation3], 1 }
 0x61e   :  { %875 = vsyncpa [#allocation6], 1 }
 0x61f   :  { %876 = vsyncpa [#allocation9], 1 }
 0x620   :  { %877 = vsyncpa [#allocation4], 1 }

</bundles_post_ra>
